<compile_context>
chip_gen: v6e
topology: v6e:2x2x1
jax: 0.10.0
libtpu: 0.0.40
codegen_flags: <defaults>
</compile_context>

<pallas_src>
import functools
import math

import numpy as np
import jax
import jax.numpy as jnp
from jax.experimental import pallas as pl
from jax.experimental.pallas import tpu as pltpu


# ------------------------- host-side helpers (glue) -------------------------

def sinusoid_pos_encoding(length: int, d_model: int) -> jnp.ndarray:
    position = np.arange(length, dtype=np.float32)[:, None]
    div_term = np.exp(
        np.arange(0, d_model, 2, dtype=np.float32) * -(math.log(10000.0) / d_model))
    pe = np.zeros((length, d_model), dtype=np.float32)
    pe[:, 0::2] = np.sin(position * div_term)
    pe[:, 1::2] = np.cos(position * div_term)
    return jnp.asarray(pe)


_ROLL_CONV = None


def _probe_roll_convention():
    """One-time calibration of pltpu.roll's (direction, stride) convention.

    Model: output row r equals np.roll(input row r, sigma*shift + tau*stride*r).
    Returns (sigma, tau) in {+1, -1}^2.  Raises if neither convention matches.
    """
    global _ROLL_CONV
    if _ROLL_CONV is not None:
        return _ROLL_CONV
    rows, n = 8, 128
    x_np = np.tile(np.arange(n, dtype=np.float32), (rows, 1))

    def probe_kernel(x_ref, o_ref):
        o_ref[...] = pltpu.roll(x_ref[...], shift=1, axis=1, stride=1, stride_axis=0)

    y = np.asarray(pl.pallas_call(
        probe_kernel,
        out_shape=jax.ShapeDtypeStruct((rows, n), jnp.float32))(jnp.asarray(x_np)))
    for sigma in (1, -1):
        for tau in (1, -1):
            want = np.stack([np.roll(x_np[r], sigma + tau * r) for r in range(rows)])
            if np.array_equal(y, want):
                _ROLL_CONV = (sigma, tau)
                return _ROLL_CONV
    raise RuntimeError("Unexpected pltpu.roll semantics; cannot build the "
                       "roll-based relative shift on this Pallas version.")


def _vmem_limit_bytes(T, D, H):
    f = 4
    io_blocks = 5 * T * D * f + H * T * T * f            # q,k,v,pos,out + attn
    weights = (5 * D * D + 6 * D) * f                     # packed weights/biases
    scratch = 10 * H * T * T * f + 10 * T * D * f         # in-kernel intermediates
    need = 2 * io_blocks + 2 * weights + scratch + (4 << 20)
    return int(min(max(need, 32 << 20), 64 << 20))        # <= v7x per-TC VMEM


# ------------------------------- the kernel ---------------------------------

def _rel_mhsa_kernel(q_ref, k_ref, v_ref, p_ref, w_ref, b_ref, uv_ref,
                     wo_ref, bo_ref, out_ref, attn_ref=None, *,
                     num_heads, mxu_dtype, sigma, tau):
    T, D = q_ref.shape[1], q_ref.shape[2]
    H = num_heads
    Dh = D // H
    inv_sqrt_d = 1.0 / math.sqrt(D)          # module scales by 1/sqrt(d_model)

    def proj(x_ref, wi, bi=None):
        # Lane-dense (T, D) x (D, D) matmul (full MXU output width), f32 accumulate.
        y = jnp.dot(x_ref[0].astype(mxu_dtype), w_ref[wi].astype(mxu_dtype),
                    preferred_element_type=jnp.float32)
        if bi is not None:
            y = y + b_ref[bi]
        return y

    q_all = proj(q_ref, 0, 0)                 # (T, D)
    k_all = proj(k_ref, 1, 1)
    v_all = proj(v_ref, 2, 2)
    p_all = proj(p_ref, 3, None)              # pos_proj has no bias

    def split_heads(x):                       # (T, D) -> (H, T, Dh), static lane slices
        return jnp.stack([x[:, h * Dh:(h + 1) * Dh] for h in range(H)], axis=0)

    qh, kh, vh, ph = (split_heads(x) for x in (q_all, k_all, v_all, p_all))
    u_b = uv_ref[0]                           # (H, 1, Dh)
    v_b = uv_ref[1]

    def hdot(a, b):                           # (H,T,Dh) x (H,T,Dh) -> (H,T,T)
        return jnp.einsum('hid,hjd->hij',
                          a.astype(mxu_dtype), b.astype(mxu_dtype),
                          preferred_element_type=jnp.float32)

    content = hdot(qh + u_b, kh)              # (H, T, T)
    pos_raw = hdot(qh + v_b, ph)              # (H, T, T)

    # ---- Transformer-XL relative shift, exact (incl. the wrap-around region) ----
    #   shifted[i, j] = pos_raw[i, (j-i-1) mod T]   for j <= i
    #                 = 0                           for j == i+1
    #                 = pos_raw[i+1, j-i-2]         for j >= i+2
    # Realised with XLU row-strided lane rotates + iota masks (O(H*T^2)),
    # replacing the former O(T^3) selectors and the 2*H*T^3 MXU shift/transpose.
    # (sigma, tau) calibrate the rolls to pltpu.roll's convention.
    shift_a = (sigma * 1) % T
    shift_b = (sigma * 2) % T
    shift_up = (sigma * (T - 1)) % T
    stride_r = tau % T

    row = jax.lax.broadcasted_iota(jnp.int32, (T, T), 0)
    col = jax.lax.broadcasted_iota(jnp.int32, (T, T), 1)
    keep_a = col <= row
    keep_b = col >= row + 2
    zeros_tt = jnp.zeros((T, T), jnp.float32)

    shifted = []
    for h in range(H):
        s = pos_raw[h]                                                # (T, T)
        # per-row lane rotate by (i + 1): rolled_a[i, j] = s[i, (j-i-1) mod T]
        rolled_a = pltpu.roll(s, shift=shift_a, axis=1,
                              stride=stride_r, stride_axis=0)
        # rows shifted up by one: s_up[i, :] = s[(i+1) mod T, :] (row T-1 masked)
        s_up = pltpu.roll(s, shift=shift_up, axis=0)
        # per-row lane rotate by (i + 2): rolled_b[i, j] = s_up[i, (j-i-2) mod T]
        rolled_b = pltpu.roll(s_up, shift=shift_b, axis=1,
                              stride=stride_r, stride_axis=0)
        shifted.append(jnp.where(keep_a, rolled_a, zeros_tt) +
                       jnp.where(keep_b, rolled_b, zeros_tt))
    pos_shift = jnp.stack(shifted, axis=0)                            # (H, T, T)

    score = (content + pos_shift) * inv_sqrt_d
    # TODO(synk): optional `mask` (masked_fill) branch not implemented.
    score = score - jnp.max(score, axis=-1, keepdims=True)
    e = jnp.exp(score)
    attn = e / jnp.sum(e, axis=-1, keepdims=True)    # exact (attn is returned)
    # TODO(synk): nn.Dropout treated as identity (eval mode / p = 0).

    ctx = jnp.einsum('hij,hjd->hid',
                     attn.astype(mxu_dtype), vh.astype(mxu_dtype),
                     preferred_element_type=jnp.float32)              # (H, T, Dh)
    # Fused output projection: concat heads along lanes, one (T,D)x(D,D) matmul.
    ctx_flat = jnp.concatenate([ctx[h] for h in range(H)], axis=-1)   # (T, D)
    out = jnp.dot(ctx_flat.astype(mxu_dtype), wo_ref[...].astype(mxu_dtype),
                  preferred_element_type=jnp.float32) + bo_ref[...]

    out_ref[0] = out.astype(out_ref.dtype)
    if attn_ref is not None:
        attn_ref[0] = attn.astype(attn_ref.dtype)


# -------------------------------- wrapper -----------------------------------

def relative_mhsa(query, key, value, pos_emb, params, *,
                  return_attn=True, mxu_dtype=jnp.float32):
    B, T, D = query.shape
    H, Dh = params["u_bias"].shape
    assert D == H * Dh, "d_model must equal num_heads * d_head"

    w_pack = jnp.stack([jnp.asarray(params[n])
                        for n in ("Wq", "Wk", "Wv", "Wpos")], axis=0)   # (4, D, D)
    b_pack = jnp.stack([jnp.asarray(params[n])
                        for n in ("bq", "bk", "bv")], axis=0).reshape(3, 1, D)
    uv_pack = jnp.stack([jnp.asarray(params["u_bias"]),
                         jnp.asarray(params["v_bias"])], axis=0).reshape(2, H, 1, Dh)
    wo = jnp.asarray(params["Wo"])                                      # (D, D)
    bo = jnp.asarray(params["bo"]).reshape(1, D)

    pos_shared = (pos_emb.shape[0] == 1)       # accept (1,T,D) or (B,T,D)
    sigma, tau = _probe_roll_convention()

    kernel = functools.partial(_rel_mhsa_kernel, num_heads=H,
                               mxu_dtype=mxu_dtype, sigma=sigma, tau=tau)

    out_shapes = [jax.ShapeDtypeStruct((B, T, D), jnp.float32)]
    out_specs = [pl.BlockSpec((1, T, D), lambda b: (b, 0, 0))]
    if return_attn:
        out_shapes.append(jax.ShapeDtypeStruct((B, H, T, T), jnp.float32))
        out_specs.append(pl.BlockSpec((1, H, T, T), lambda b: (b, 0, 0, 0)))

    def build(single_buffer_consts):
        def const_spec(shape):
            nd = len(shape)
            kw = {"pipeline_mode": pl.Buffered(1)} if single_buffer_consts else {}
            return pl.BlockSpec(shape, lambda b, _nd=nd: (0,) * _nd, **kw)

        pos_spec = (const_spec((1, T, D)) if pos_shared
                    else pl.BlockSpec((1, T, D), lambda b: (b, 0, 0)))
        in_specs = [
            pl.BlockSpec((1, T, D), lambda b: (b, 0, 0)),   # query
            pl.BlockSpec((1, T, D), lambda b: (b, 0, 0)),   # key
            pl.BlockSpec((1, T, D), lambda b: (b, 0, 0)),   # value
            pos_spec,                                       # pos_embedding
            const_spec((4, D, D)),                          # Wq|Wk|Wv|Wpos
            const_spec((3, 1, D)),                          # bq|bk|bv
            const_spec((2, H, 1, Dh)),                      # u_bias|v_bias
            const_spec((D, D)),                             # Wo
            const_spec((1, D)),                             # bo
        ]
        return pl.pallas_call(
            kernel,
            grid=(B,),
            in_specs=in_specs,
            out_specs=tuple(out_specs),
            out_shape=tuple(out_shapes),
            compiler_params=pltpu.CompilerParams(
                dimension_semantics=("parallel",),
                vmem_limit_bytes=_vmem_limit_bytes(T, D, H)),
        )

    operands = (query, key, value, pos_emb, w_pack, b_pack, uv_pack, wo, bo)
    try:
        res = jax.block_until_ready(build(True)(*operands))
    except Exception:
        # pipeline_mode=pl.Buffered(1) unsupported on this jax/libtpu: fall back
        # to default double-buffered constant operands.
        res = jax.block_until_ready(build(False)(*operands))

    if return_attn:
        return res[0], res[1]
    return res[0]


# --------------------------- pure-JAX reference ------------------------------

def _relative_shift_ref(pos_score):
    B, H, T1, T2 = pos_score.shape
    zeros = jnp.zeros((B, H, T1, 1), pos_score.dtype)
    padded = jnp.concatenate([zeros, pos_score], axis=-1)
    padded = padded.reshape(B, H, T2 + 1, T1)
    return padded[:, :, 1:].reshape(B, H, T1, T2)


def reference(query, key, value, pos_emb, params):
    B, T, D = query.shape
    H, Dh = params["u_bias"].shape
    q = (query @ params["Wq"] + params["bq"]).reshape(B, T, H, Dh)
    k = (key @ params["Wk"] + params["bk"]).reshape(B, T, H, Dh).transpose(0, 2, 1, 3)
    v = (value @ params["Wv"] + params["bv"]).reshape(B, T, H, Dh).transpose(0, 2, 1, 3)
    p = (pos_emb @ params["Wpos"]).reshape(B, T, H, Dh)
    u, vb = params["u_bias"], params["v_bias"]
    content = jnp.einsum('bihd,bhjd->bhij', q + u, k)
    pos_score = jnp.einsum('bihd,bjhd->bhij', q + vb, p)
    pos_score = _relative_shift_ref(pos_score)
    score = (content + pos_score) / math.sqrt(D)
    attn = jax.nn.softmax(score, axis=-1)
    ctx = jnp.einsum('bhij,bhjd->bihd', attn, v).reshape(B, T, D)
    out = ctx @ params["Wo"] + params["bo"]
    return out, attn


# ---------------------------------- main -------------------------------------

if __name__ == "__main__":
    B, T, D, H = 2, 8, 32, 4
    Dh = D // H          # d_k = d_v = d_head = 8

    key0 = jax.random.PRNGKey(0)
    ks = jax.random.split(key0, 16)

    def w(kk, shape, scale=0.1):
        return (scale * jax.random.normal(kk, shape)).astype(jnp.float32)

    params = {
        "Wq": w(ks[0], (D, D)), "bq": w(ks[1], (D,)),
        "Wk": w(ks[2], (D, D)), "bk": w(ks[3], (D,)),
        "Wv": w(ks[4], (D, D)), "bv": w(ks[5], (D,)),
        "Wpos": w(ks[6], (D, D)),
        "u_bias": w(ks[7], (H, Dh)), "v_bias": w(ks[8], (H, Dh)),
        "Wo": w(ks[9], (D, D)), "bo": w(ks[10], (D,)),
    }

    query = jax.random.normal(ks[11], (B, T, D), jnp.float32)
    key_in = jax.random.normal(ks[12], (B, T, D), jnp.float32)
    value = jax.random.normal(ks[13], (B, T, D), jnp.float32)
    pos_emb = jnp.asarray(sinusoid_pos_encoding(T, D)[None], jnp.float32)  # (1, T, D)

    # f32 MXU path, with the attention map output (matches the module exactly).
    out, attn = relative_mhsa(query, key_in, value, pos_emb, params)
    jax.block_until_ready((out, attn))

    ref_out, ref_attn = reference(query, key_in, value,
                                  jnp.broadcast_to(pos_emb, (B, T, D)), params)
    np.testing.assert_allclose(np.asarray(out), np.asarray(ref_out),
                               rtol=2e-3, atol=2e-3)
    np.testing.assert_allclose(np.asarray(attn), np.asarray(ref_attn),
                               rtol=2e-3, atol=2e-3)

    # bf16 MXU inputs (recommended on v6e/v7x) and no attention-map output.
    out_bf16 = relative_mhsa(query, key_in, value, pos_emb, params,
                             return_attn=False, mxu_dtype=jnp.bfloat16)
    jax.block_until_ready(out_bf16)
    np.testing.assert_allclose(np.asarray(out_bf16), np.asarray(ref_out),
                               rtol=2e-2, atol=2e-2)

    print("KERNEL_OK")
</pallas_src>

<mosaic_0001>
module attributes {stable_mosaic.version = 11 : i64} {
  func.func @probe_kernel(%arg0: memref<8x128xf32, #tpu.memory_space<vmem>>, %arg1: memref<8x128xf32, #tpu.memory_space<vmem>>) attributes {dimension_semantics = [], scalar_prefetch = 0 : i64, scratch_operands = 0 : i64, tpu.core_type = #tpu.core_type<tc>} {
    %c0 = arith.constant 0 : index
    %c0_0 = arith.constant 0 : index
    %0 = vector.load %arg0[%c0, %c0_0] : memref<8x128xf32, #tpu.memory_space<vmem>>, vector<8x128xf32>
    %c1_i32 = arith.constant 1 : i32
    %1 = tpu.dynamic_rotate %0 by %c1_i32 dim 1 {stride = 1 : si32, stride_dimension = 0 : si32} : vector<8x128xf32>, i32 -> vector<8x128xf32>
    %c0_1 = arith.constant 0 : index
    %c0_2 = arith.constant 0 : index
    %2 = vector.load %arg1[%c0_1, %c0_2] : memref<8x128xf32, #tpu.memory_space<vmem>>, vector<8x128xf32>
    tpu.vector_store %arg1[%c0_1, %c0_2], %1 {strides = array<i32>} : memref<8x128xf32, #tpu.memory_space<vmem>>, vector<8x128xf32>,
    return
  }
}

</mosaic_0001>

<bundles_post_ra>
// kernel: tpu_custom_call.1
= control target key start
LH: loop header
LB: loop body
LE: loop exit
PB: predicated region body
PF: predicated region fallthrough
CT: control target
= control target key end

     0   :  { %6 = vsyncpa [#allocation3], 0  ;;  %s108_s0 = inlined_call_operand.hbm [shape: f32[8,128], index: 0, kind: input, shape index: {}]   ;;  %s109_s1 = inlined_call_operand.hbm [shape: f32[8,128], index: 1, kind: output, shape index: {}]  }
   0x1   :  { %7 = vsyncpa [#allocation4], 0  ;;  %s89_s6 = smov [#allocation2]  }
   0x2   :  { %s14_s7 = sshll.u32 %s89_s6, 4  ;;  %s15_s7 = int_to_ptr.vmem [resolvable:$true] %s14_s7 }
   0x3   :  { %s53_s8 = scalar_lea.vmem %s15_s7, 128  ;;  %p58_p1 = scmp.lt.s32.totalorder %s15_s7, %s15_s7 }
   0x4   :  { %p54_p0 = scmp.ne.s32.totalorder %s15_s7, %s53_s8  ;;  %p59_p2 = scmp.lt.s32.totalorder %s53_s8, %s53_s8 }
   0x6   :  { %p60_p3 = por %p59_p2, %p58_p1 }
   0x8   :  { %p61_p4 = pnand %p60_p3, %p54_p0 }
   0xa   :  { %64 = shalt.err (!%p61_p4)
}
   0xb   :  { %17 = dma.hbm_to_vmem [thread:$0]  %s108_s0, 128, %s15_s7, [#allocation3]  }
   0xc   :  { %85 = dma.done.wait [#allocation3], 128  }
   0xd   :  { %86 = vsyncadd [#allocation3], 4294967168  ;;  %v21_v0 = vld [vmem:[#allocation2] sm:$0xff]  ;;  %s90_s11 = smov 257   ;;  %s91_s12 = smov [#allocation5]  }
   0xe   :  { %24 = vrot.lane.b32.xlu0 %v21_v0, %s90_s11  ;;  %s33_s13 = sshll.u32 %s91_s12, 4  ;;  %s34_s13 = int_to_ptr.vmem [resolvable:$true] %s33_s13 }
   0xf   :  { %s65_s14 = scalar_lea.vmem %s34_s13, 128  ;;  %p70_p6 = scmp.lt.s32.totalorder %s34_s13, %s34_s13 }
  0x10   :  { %p66_p5 = scmp.ne.s32.totalorder %s34_s13, %s65_s14  ;;  %p71_p7 = scmp.lt.s32.totalorder %s65_s14, %s65_s14 }
  0x12   :  { %p72_p8 = por %p71_p7, %p70_p6 }
  0x14   :  { %p73_p9 = pnand %p72_p8, %p66_p5 }
  0x80   :  { %v25_v1 = vpop.permute.xlu0 %24 }
  0x81   :  { %26 = vst [vmem:[#allocation5] sm:$0xff] %v25_v1 }
  0x82   :  { %76 = shalt.err (!%p73_p9)
}
  0x83   :  { %36 = dma.vmem_to_hbm [thread:$0]  %s34_s13, 128, %s109_s1, [#allocation4]  }
  0x84   :  { %87 = dma.done.wait [#allocation4], 128  }
  0x85   :  { %88 = vsyncadd [#allocation4], 4294967168 }
  0x86   :  { %40 = vsyncpa [#allocation3], 1 }
  0x87   :  { %41 = vsyncpa [#allocation4], 1 }

</bundles_post_ra>
